<compile_context>
chip_gen: v5e
topology: v5e:2x2
jax: 0.10.0
libtpu: 0.0.40
codegen_flags: <defaults>
</compile_context>

<pallas_src>
import math

import jax
import jax.numpy as jnp
import numpy as np
from jax.experimental import pallas as pl
from jax.experimental.pallas import tpu as pltpu


# -----------------------------------------------------------------------------
# Small helpers / constant construction (plain numpy / JAX glue)
# -----------------------------------------------------------------------------
def _round_up(x: int, m: int) -> int:
    return (x + m - 1) // m * m


def _cdiv(a: int, b: int) -> int:
    return (a + b - 1) // b


def hann_window(win_length: int) -> np.ndarray:
    # torch.hann_window(win_length, periodic=True)
    n = np.arange(win_length, dtype=np.float64)
    return (0.5 * (1.0 - np.cos(2.0 * np.pi * n / win_length))).astype(np.float32)


def dft_matrices(n_fft: int) -> tuple[np.ndarray, np.ndarray]:
    # One-sided DFT as two real matmuls: X = xw @ C + i * (xw @ S)
    n_freqs = n_fft // 2 + 1
    n = np.arange(n_fft, dtype=np.float64)[:, None]          # (n_fft, 1)
    f = np.arange(n_freqs, dtype=np.float64)[None, :]        # (1, n_freqs)
    ang = 2.0 * np.pi * n * f / n_fft
    cos_mat = np.cos(ang).astype(np.float32)                 # (n_fft, n_freqs)
    sin_mat = (-np.sin(ang)).astype(np.float32)              # (n_fft, n_freqs)
    return cos_mat, sin_mat


def melscale_fbanks(n_freqs: int, f_min: float, f_max: float,
                    n_mels: int, sample_rate: int) -> np.ndarray:
    # torchaudio.functional.melscale_fbanks with mel_scale="htk", norm=None
    def hz_to_mel(f):
        return 2595.0 * np.log10(1.0 + f / 700.0)

    def mel_to_hz(m):
        return 700.0 * (10.0 ** (m / 2595.0) - 1.0)

    all_freqs = np.linspace(0.0, sample_rate // 2, n_freqs)
    m_min, m_max = hz_to_mel(f_min), hz_to_mel(f_max)
    m_pts = np.linspace(m_min, m_max, n_mels + 2)
    f_pts = mel_to_hz(m_pts)
    f_diff = f_pts[1:] - f_pts[:-1]                          # (n_mels + 1,)
    slopes = f_pts[None, :] - all_freqs[:, None]             # (n_freqs, n_mels + 2)
    down = -slopes[:, :-2] / f_diff[:-1]
    up = slopes[:, 2:] / f_diff[1:]
    fb = np.maximum(0.0, np.minimum(down, up))
    return fb.astype(np.float32)                             # (n_freqs, n_mels)


def frame_signal(samples: jnp.ndarray, n_fft: int, hop_length: int) -> jnp.ndarray:
    # torch.stft(center=True, pad_mode="reflect") framing.
    # NOTE: requires samples.shape[1] > n_fft // 2 for the reflect padding.
    pad = n_fft // 2
    padded = jnp.pad(samples, ((0, 0), (pad, pad)), mode="reflect")
    n_frames = 1 + samples.shape[1] // hop_length
    idx = (np.arange(n_frames)[:, None] * hop_length
           + np.arange(n_fft)[None, :])                      # (n_frames, n_fft)
    return padded[:, idx]                                    # (B, n_frames, n_fft)


# -----------------------------------------------------------------------------
# Pallas kernel: fused (windowed DFT, packed re|im) -> square -> (mel*Linear)
# -----------------------------------------------------------------------------
def wav_embedding_kernel(frames_ref, cs_ref, fbw_ref, bias_ref, out_ref):
    # frames_ref: (m_tile, n_fft)        cs_ref:   (n_fft, ri_pad)
    # fbw_ref:    (ri_pad, emb_pad)      bias_ref: (1, emb_pad)
    # out_ref:    (m_tile, emb_pad)
    ri = jnp.dot(frames_ref[...], cs_ref[...],
                 preferred_element_type=jnp.float32)         # MXU: packed [re|im]
    sq = ri * ri                                             # VPU: squares only;
    # the re^2 + im^2 sum per frequency is folded into fb_w (duplicated rows).
    out = jnp.dot(sq, fbw_ref[...],
                  preferred_element_type=jnp.float32) + bias_ref[...]
    out_ref[...] = out.astype(out_ref.dtype)


def wav_embedding(samples, window, cos_mat, sin_mat, fb, weight, bias, *,
                  n_fft: int, hop_length: int, m_tile_max: int = 512):
    assert n_fft % 2 == 0, "re/im packing assumes an even n_fft (Nyquist bin exists)"
    B, _ = samples.shape
    n_freqs = n_fft // 2 + 1
    emb_size = weight.shape[0]
    emb_pad = _round_up(emb_size, 128)

    # ---- offline constant folding -------------------------------------------
    # Center-pad the window to n_fft (torch.stft semantics for win_length < n_fft),
    # then fold it into the DFT matrices.
    win_length = window.shape[0]
    if win_length < n_fft:
        lpad = (n_fft - win_length) // 2
        window = jnp.pad(window, (lpad, n_fft - win_length - lpad))
    cos_w = window[:, None] * cos_mat                        # (n_fft, n_freqs)
    sin_w = window[:, None] * sin_mat                        # (n_fft, n_freqs)

    # Exact re/im packing: im[0] == im[n_freqs-1] == 0, so only n_freqs-2 sin
    # columns are needed -> ri_cols == n_fft output lanes for the DFT matmul.
    ri_cols = n_freqs + (n_freqs - 2)                        # == n_fft
    ri_pad = _round_up(ri_cols, 128)
    cs = jnp.zeros((n_fft, ri_pad), jnp.float32)
    cs = cs.at[:, :n_freqs].set(cos_w)
    cs = cs.at[:, n_freqs:ri_cols].set(sin_w[:, 1:n_freqs - 1])

    # Mel filterbank folded into the Linear weight; im rows duplicate the
    # corresponding re rows so that sq @ fb_w == power @ (fb @ W.T).
    fbW = fb @ weight.T                                      # (n_freqs, emb_size)
    fb_w = jnp.zeros((ri_pad, emb_pad), jnp.float32)
    fb_w = fb_w.at[:n_freqs, :emb_size].set(fbW)
    fb_w = fb_w.at[n_freqs:ri_cols, :emb_size].set(fbW[1:n_freqs - 1])
    bias_p = jnp.zeros((1, emb_pad), jnp.float32).at[0, :emb_size].set(bias)

    # ---- framing + flatten batch*frames into one padded M axis --------------
    frames = frame_signal(samples, n_fft, hop_length)        # (B, n_frames, n_fft)
    n_frames = frames.shape[1]
    M = B * n_frames

    # Tile selection: bound zero-row padding to a few rows per tile, and force
    # >= 2 grid steps (when there is enough work) so both TensorCores on
    # megacore parts (v7x) get a share of the "parallel" M axis.
    num_tiles = max(_cdiv(M, m_tile_max), 2 if M >= 16 else 1)
    m_tile = _round_up(_cdiv(M, num_tiles), 8)
    M_pad = num_tiles * m_tile
    frames2d = frames.reshape(M, n_fft)
    if M_pad != M:
        frames2d = jnp.pad(frames2d, ((0, M_pad - M), (0, 0)))

    # ---- cost estimate (post re/im packing) ----------------------------------
    flops = (2 * M_pad * n_fft * ri_pad                      # DFT matmul
             + M_pad * ri_pad                                # square
             + 2 * M_pad * ri_pad * emb_pad)                 # mel+linear matmul
    bytes_accessed = 4 * (M_pad * n_fft
                          + n_fft * ri_pad
                          + ri_pad * emb_pad
                          + emb_pad
                          + M_pad * emb_pad)

    out_pad = pl.pallas_call(
        wav_embedding_kernel,
        out_shape=jax.ShapeDtypeStruct((M_pad, emb_pad), jnp.float32),
        grid_spec=pltpu.PrefetchScalarGridSpec(
            num_scalar_prefetch=0,
            grid=(num_tiles,),
            in_specs=[
                pl.BlockSpec((m_tile, n_fft), lambda i: (i, 0)),
                pl.BlockSpec((n_fft, ri_pad), lambda i: (0, 0)),
                pl.BlockSpec((ri_pad, emb_pad), lambda i: (0, 0)),
                pl.BlockSpec((1, emb_pad), lambda i: (0, 0)),
            ],
            out_specs=pl.BlockSpec((m_tile, emb_pad), lambda i: (i, 0)),
        ),
        compiler_params=pltpu.CompilerParams(
            dimension_semantics=("parallel",)),
        cost_estimate=pl.CostEstimate(flops=flops, transcendentals=0,
                                      bytes_accessed=bytes_accessed),
    )(frames2d, cs, fb_w, bias_p)

    return out_pad[:M, :emb_size].reshape(B, n_frames, emb_size)


# -----------------------------------------------------------------------------
# Reference (plain JAX, unfolded) for sanity check
# -----------------------------------------------------------------------------
def reference(samples, window, cos_mat, sin_mat, fb, weight, bias,
              *, n_fft: int, hop_length: int):
    frames = frame_signal(samples, n_fft, hop_length)
    xw = frames * window[None, None, :]
    re = jnp.einsum("btn,nf->btf", xw, cos_mat)
    im = jnp.einsum("btn,nf->btf", xw, sin_mat)
    power = re * re + im * im
    mel = jnp.einsum("btf,fm->btm", power, fb)               # (B, n_frames, n_mels)
    return jnp.einsum("btm,em->bte", mel, weight) + bias[None, None, :]


# -----------------------------------------------------------------------------
if __name__ == "__main__":
    # Small-shape configuration consistent with the module's forward pass.
    batch = 2
    sample_length = 2048       # number of audio samples per example
    frame_rate = 8000          # sample rate fed to the mel filterbank
    emb_size = 32
    n_fft = 256
    win_length = 256
    hop_length = 128
    n_mels = 128
    n_freqs = n_fft // 2 + 1

    # Deterministic parameters (synthetic; no checkpoint load).
    key = jax.random.PRNGKey(0)
    k_x, k_w, k_b = jax.random.split(key, 3)
    samples = jax.random.normal(k_x, (batch, sample_length), dtype=jnp.float32)

    bound = 1.0 / math.sqrt(n_mels)   # nn.Linear default init range
    weight = jax.random.uniform(k_w, (emb_size, n_mels), jnp.float32, -bound, bound)
    bias = jax.random.uniform(k_b, (emb_size,), jnp.float32, -bound, bound)

    window = jnp.asarray(hann_window(win_length))
    cos_np, sin_np = dft_matrices(n_fft)
    cos_mat = jnp.asarray(cos_np)
    sin_mat = jnp.asarray(sin_np)
    fb = jnp.asarray(melscale_fbanks(n_freqs, 0.0, frame_rate / 2.0,
                                     n_mels, frame_rate))

    out = wav_embedding(samples, window, cos_mat, sin_mat, fb, weight, bias,
                        n_fft=n_fft, hop_length=hop_length)
    out = jax.block_until_ready(out)

    ref = reference(samples, window, cos_mat, sin_mat, fb, weight, bias,
                    n_fft=n_fft, hop_length=hop_length)
    ref = jax.block_until_ready(ref)

    assert out.shape == (batch, 1 + sample_length // hop_length, emb_size)
    np.testing.assert_allclose(np.asarray(out), np.asarray(ref),
                               rtol=1e-3, atol=1e-3)
    print("KERNEL_OK")
</pallas_src>

<mosaic_0001>
module attributes {stable_mosaic.version = 11 : i64} {
  func.func @wav_embedding_kernel(%arg0: i32, %arg1: memref<24x256xf32, #tpu.memory_space<vmem>>, %arg2: memref<256x256xf32, #tpu.memory_space<vmem>>, %arg3: memref<256x128xf32, #tpu.memory_space<vmem>>, %arg4: memref<1x128xf32, #tpu.memory_space<vmem>>, %arg5: memref<24x128xf32, #tpu.memory_space<vmem>>) attributes {dimension_semantics = [#tpu.dimension_semantics<parallel>], iteration_bounds = array<i64: 2>, scalar_prefetch = 0 : i64, scratch_operands = 0 : i64, tpu.core_type = #tpu.core_type<tc>, window_params = [{transform_indices = @transform_0, window_bounds = array<i64: 24, 256>}, {pipeline_mode = #tpu.pipeline_mode<synchronous>, transform_indices = @transform_1, window_bounds = array<i64: 256, 256>}, {pipeline_mode = #tpu.pipeline_mode<synchronous>, transform_indices = @transform_2, window_bounds = array<i64: 256, 128>}, {pipeline_mode = #tpu.pipeline_mode<synchronous>, transform_indices = @transform_3, window_bounds = array<i64: 1, 128>}, {transform_indices = @transform_4, window_bounds = array<i64: 24, 128>}]} {
    %c0 = arith.constant 0 : index
    %c0_0 = arith.constant 0 : index
    %0 = vector.load %arg1[%c0, %c0_0] : memref<24x256xf32, #tpu.memory_space<vmem>>, vector<24x256xf32>
    %c0_1 = arith.constant 0 : index
    %c0_2 = arith.constant 0 : index
    %1 = vector.load %arg2[%c0_1, %c0_2] : memref<256x256xf32, #tpu.memory_space<vmem>>, vector<256x256xf32>
    %cst = arith.constant dense<0.000000e+00> : vector<24x256xf32>
    %2 = tpu.matmul %0, %1, %cst {dimension_numbers = #tpu.dot_dimension_numbers<[1], [0], [0], [1], [0, 0, 1, 1], [], []>} : vector<24x256xf32>, vector<256x256xf32>, vector<24x256xf32> -> vector<24x256xf32>
    %3 = arith.mulf %2, %2 : vector<24x256xf32>
    %c0_3 = arith.constant 0 : index
    %c0_4 = arith.constant 0 : index
    %4 = vector.load %arg3[%c0_3, %c0_4] : memref<256x128xf32, #tpu.memory_space<vmem>>, vector<256x128xf32>
    %cst_5 = arith.constant dense<0.000000e+00> : vector<24x128xf32>
    %5 = tpu.matmul %3, %4, %cst_5 {dimension_numbers = #tpu.dot_dimension_numbers<[1], [0], [0], [1], [0, 0, 1, 1], [], []>} : vector<24x256xf32>, vector<256x128xf32>, vector<24x128xf32> -> vector<24x128xf32>
    %c0_6 = arith.constant 0 : index
    %c0_7 = arith.constant 0 : index
    %6 = vector.load %arg4[%c0_6, %c0_7] : memref<1x128xf32, #tpu.memory_space<vmem>>, vector<1x128xf32>
    %7 = vector.broadcast %6 : vector<1x128xf32> to vector<24x128xf32>
    %8 = arith.addf %5, %7 : vector<24x128xf32>
    %c0_8 = arith.constant 0 : index
    %c0_9 = arith.constant 0 : index
    %9 = vector.load %arg5[%c0_8, %c0_9] : memref<24x128xf32, #tpu.memory_space<vmem>>, vector<24x128xf32>
    tpu.vector_store %arg5[%c0_8, %c0_9], %8 {strides = array<i32>} : memref<24x128xf32, #tpu.memory_space<vmem>>, vector<24x128xf32>,
    return
  }
  func.func @transform_0(%arg0: i32) -> (i32, i32) {
    %c0_i32 = arith.constant 0 : i32
    %c0_i32_0 = arith.constant 0 : i32
    return %arg0, %c0_i32 : i32, i32
  }
  func.func @transform_1(%arg0: i32) -> (i32, i32) {
    %c0_i32 = arith.constant 0 : i32
    %c0_i32_0 = arith.constant 0 : i32
    %c0_i32_1 = arith.constant 0 : i32
    return %c0_i32, %c0_i32_0 : i32, i32
  }
  func.func @transform_2(%arg0: i32) -> (i32, i32) {
    %c0_i32 = arith.constant 0 : i32
    %c0_i32_0 = arith.constant 0 : i32
    %c0_i32_1 = arith.constant 0 : i32
    return %c0_i32, %c0_i32_0 : i32, i32
  }
  func.func @transform_3(%arg0: i32) -> (i32, i32) {
    %c0_i32 = arith.constant 0 : i32
    %c0_i32_0 = arith.constant 0 : i32
    %c0_i32_1 = arith.constant 0 : i32
    return %c0_i32, %c0_i32_0 : i32, i32
  }
  func.func @transform_4(%arg0: i32) -> (i32, i32) {
    %c0_i32 = arith.constant 0 : i32
    %c0_i32_0 = arith.constant 0 : i32
    return %arg0, %c0_i32 : i32, i32
  }
}

</mosaic_0001>

<bundles_post_ra>
// kernel: tpu_custom_call.1
= control target key start
LH: loop header
LB: loop body
LE: loop exit
PB: predicated region body
PF: predicated region fallthrough
CT: control target
= control target key end

     0   :  { %9 = vsyncpa [#allocation3], 0  ;;  %s1113_s0 = inlined_call_operand.hbm [shape: f32[48,256], index: 0, kind: input, shape index: {}]   ;;  %s1114_s1 = inlined_call_operand.hbm [shape: f32[256,256], index: 1, kind: input, shape index: {}]   ;;  %s1115_s2 = inlined_call_operand.hbm [shape: f32[256,128], index: 2, kind: input, shape index: {}]   ;;  %s1116_s3 = inlined_call_operand.vmem [shape: f32[1,128], index: 3, kind: input, shape index: {}]   ;;  %s1117_s4 = inlined_call_operand.hbm [shape: f32[48,128], index: 4, kind: output, shape index: {}]  }
   0x1   :  { %11 = vsyncpa [#allocation3 + $0x1], 0 }
   0x2   :  { %12 = vsyncpa [#allocation6], 0 }
   0x3   :  { %13 = vsyncpa [#allocation4], 0 }
   0x4   :  { %15 = vsyncpa [#allocation4 + $0x1], 0  ;;  %s954_s15 = smov 0   ;;  %s956_s16 = smov 0  }
   0x5   :  { %s958_s17 = smov 0   ;;  %s960_s18 = smov 0  }
   0x6 LB: > { %s975_s19 = sadd.s32 4294967295, %s919_s18   ;;  %s633_s20 = sadd.s32 4294967294, %s919_s18   ;;  %s919_s18 = sphi %s960_s18, %s1131_s18   ;;  %s915_s17 = sphi %s958_s17, %s1130_s17   ;;  %s911_s16 = sphi %s956_s16, %s1129_s16   ;;  %s907_s15 = sphi %s954_s15, %s1128_s15  }
   0x7   : > { %p41_p0 = scmp.ne.s32.totalorder %s911_s16, %s907_s15  ;;  %p42_p1 = scmp.eq.s32.totalorder %s975_s19, 0 }
   0x8   : > { %p128_p2 = scmp.eq.s32.totalorder %s975_s19, 1  ;;  %p134_p3 = scmp.eq.s32.totalorder %s633_s20, 1 }
   0x9   : > { %p984_p4 = por %p42_p1, %p41_p0  ;;  %p634_p5 = scmp.ge.s32.totalorder %s919_s18, 1 }
   0xa   : > { %p989_p6 = por %p134_p3, %p41_p0  ;;  %p141_p7 = scmp.lt.s32.totalorder %s919_s18, 3 }
   0xb   : > { %s152_s25 = sshll.u32 %s1114_s1, 4  ;;  %s921_s27 = smov [#allocation5]   ;;  %s153_s25 = int_to_ptr.hbm [resolvable:$true] %s152_s25 }
   0xc   : > { %p997_p8 = pnand %p634_p5, %p141_p7  ;;  %s154_s28 = sshll.u32 %s921_s27, 4  ;;  %s155_s28 = int_to_ptr.vmem [resolvable:$true] %s154_s28 }
   0xd   : > { %s166_s5 = sshll.u32 %s1115_s2, 4  ;;  %s1118_s6 = smov 256   ;;  %s167_s5 = int_to_ptr.hbm [resolvable:$true] %s166_s5 }
   0xe   : > { %p697_p9 = pneg %p997_p8  ;;  %s1119_s7 = smov 16  }
   0xf   : > { %s924_s8 = smov [#allocation7]   ;;  %s925_s10 = smov 128  }
  0x10   : > { %p698_p10 = pnand %p697_p9, %p42_p1  ;;  %s168_s9 = sshll.u32 %s924_s8, 4  ;;  %s169_s9 = int_to_ptr.vmem [resolvable:$true] %s168_s9 }
  0x11   : > { %s926_s11 = smov 8   ;;  %s1013_s12 = sadd.s32 1, %s919_s18  }
  0x12   : > { %700 = dma.hbm_to_vmem [thread:$0]  (!%p698_p10), %s153_s25, 8192, %s155_s28, [#allocation6], %s1118_s6, %s1118_s6, %s1119_s7  }
  0x13   : > { %703 = dma.hbm_to_vmem [thread:$0]  (!%p698_p10), %s167_s5, 4096, %s169_s9, [#allocation6], %s925_s10, %s925_s10, %s926_s11  }
  0x14   : > { %s25_s13 = ssub.s32 %s919_s18, %s1013_s12  ;;  %s28_s14 = sadd.s32 1, %s915_s17 }
  0x15   : > { %p26_p12 = scmp.eq.s32.totalorder %s25_s13, 0  ;;  %p35_p13 = scmp.ne.s32.totalorder %s915_s17, %s911_s16 }
  0x16   : > { %p36_p0 = scmp.eq.s32.totalorder %s919_s18, 0  ;;  %p714_p7 = scmp.lt.s32.totalorder %s919_s18, 2 }
  0x17   : > { %s1022_s20 = scalar_select %p26_p12, %s915_s17, %s28_s14  }
  0x18   : > { %p37_p3 = por %p36_p0, %p35_p13  ;;  %p1026_p5 = por %p128_p2, %p35_p13 }
  0x19   : > { %s185_s24 = sand.u32 1, %s915_s17   ;;  %s649_s27 = smul.u32 48, %s919_s18 }
  0x1a   : > { %s682_s25 = smul.u32 48, %s185_s24  ;;  %p1033_p9 = pnand %p714_p7, %p37_p3 }
  0x1b   : > { %s195_s5 = scalar_lea.hbm %s1113_s0, %s649_s27  ;;  %s186_s11 = scalar_lea.sflag [#allocation3], %s185_s24 }
  0x1c   : > { %s189_s8 = scalar_lea.vmem [#allocation2], %s682_s25  ;;  %s196_s10 = sshll.u32 %s195_s5, 4  ;;  %s197_s10 = int_to_ptr.hbm [resolvable:$true] %s196_s10 }
  0x1d   : > { %s198_s9 = sshll.u32 %s189_s8, 4  ;;  %s819_s13 = sshra.s32 %s197_s10, 4  ;;  %s199_s9 = int_to_ptr.vmem [resolvable:$true] %s198_s9  ;;  %s820_s13 = int_to_ptr.hbm [resolvable:$true] %s819_s13 }
  0x1e   : > { %s821_s14 = scalar_lea.hbm %s820_s13, 48  ;;  %p823_p10 = pneg %p1033_p9 }
  0x1f   : > { %p822_p2 = scmp.ne.s32.totalorder %s820_s13, %s821_s14  ;;  %s826_s29 = scalar_lea.hbm %s1113_s0, 96 }
  0x20   : > { %p827_p0 = scmp.lt.s32.totalorder %s820_s13, %s1113_s0  ;;  %p828_p3 = scmp.lt.s32.totalorder %s826_s29, %s821_s14 }
  0x21   : > { %p824_p12 = pnand %p823_p10, %p822_p2 }
  0x22   : > { %p829_p7 = por %p828_p3, %p827_p0 }
  0x23   : > { %p825_p13 = pneg %p824_p12 }
  0x25   : > { %p830_p11 = pnand %p829_p7, %p825_p13 }
  0x27   : > { %833 = shalt.err (!%p830_p11)
}
  0x28   : > { %s1125_s24 = smov 16   ;;  %s1126_s25 = smov 256  }
  0x29   : > { %707 = dma.hbm_to_vmem [thread:$0]  (!%p1033_p9), %s197_s10, 768, %s199_s9, %s186_s11, %s1126_s25, %s1126_s25, %s1125_s24  }
  0x2a   : > { %210 = sbr.rel (%p997_p8) target bundleno = 373 (0x175), region = 36  ;;  %s1056_s6 = sand.u32 (!%p997_p8), 1, %s911_s16  }
  0x2b   : > { %s683_s7 = smul.u32 (!%p997_p8), 48, %s1056_s6  ;;  %s213_s5 = scalar_lea.sflag (!%p997_p8), [#allocation3], %s1056_s6 }
  0x2d   : > { %s1060_s8 = scalar_lea.vmem (!%p997_p8), [#allocation2], %s683_s7 }
  0x2f   : > { %894 = dma.done.wait (%p984_p4), %s213_s5, 768  }
  0x30   : > { %896 = vsyncadd (%p984_p4), %s213_s5, 4294966528 }
  0x31   : > { %898 = dma.done.wait (%p42_p1), [#allocation6], 12288  }
  0x32   : > { %900 = vsyncadd (%p42_p1), [#allocation6], 4294955008  ;;  %v291_v0 = vld [vmem:[#allocation5 + $0xf8] sm:$0xff]  ;;  %v289_v2 = vld [vmem:[#allocation5 + $0xe8] sm:$0xff]  ;;  %s684_s28 = smul.u32 24, %s1056_s6  ;;  %s526_s27 = scalar_lea.sflag [#allocation4], %s1056_s6 }
  0x33   : > { %v323_v1 = vld [vmem:[#allocation5 + $0x1f8] sm:$0xff]  ;;  %376 = vmatpush.msra.mxu2 %v291_v0  ;;  %v321_v3 = vld [vmem:[#allocation5 + $0x1e8] sm:$0xff]  ;;  %v290_v4 = vld [vmem:[#allocation5 + $0xf0] sm:$0xff]  ;;  %s648_s10 = smul.u32 24, %s975_s19  ;;  %s869_s5 = scalar_lea.hbm %s1117_s4, 48 }
  0x34   : > { %402 = vmatpush.msra.mxu3 %v323_v1  ;;  %v322_v5 = vld [vmem:[#allocation5 + $0x1f0] sm:$0xff]  ;;  %324 = vmatpush.msra.mxu0 %v290_v4  ;;  %v287_v6 = vld [vmem:[#allocation5 + $0xd8] sm:$0xff]  ;;  %v288_v8 = vld [vmem:[#allocation5 + $0xe0] sm:$0xff]  ;;  %s251_s9 = scalar_lea.vmem [#allocation8], %s684_s28 }
  0x35   : > { %350 = vmatpush.msra.mxu1 %v322_v5  ;;  %v319_v7 = vld [vmem:[#allocation5 + $0x1d8] sm:$0xff]  ;;  %377 = vmatpush.msra.mxu2 %v289_v2  ;;  %v320_v9 = vld [vmem:[#allocation5 + $0x1e0] sm:$0xff]  ;;  %v285_v10 = vld [vmem:[#allocation5 + $0xc8] sm:$0xff]  ;;  %s537_s14 = scalar_lea.hbm %s1117_s4, %s648_s10  ;;  %s538_s29 = sshll.u32 %s251_s9, 4  ;;  %s539_s29 = int_to_ptr.vmem [resolvable:$true] %s538_s29 }
  0x36   : > { %403 = vmatpush.msra.mxu3 %v321_v3  ;;  %325 = vmatpush.msra.mxu0 %v288_v8  ;;  %v317_v11 = vld [vmem:[#allocation5 + $0x1c8] sm:$0xff]  ;;  %v286_v12 = vld [vmem:[#allocation5 + $0xd0] sm:$0xff]  ;;  %v284_v14 = vld [vmem:[#allocation5 + $0xc0] sm:$0xff]  ;;  %s540_s30 = sshll.u32 %s537_s14, 4  ;;  %s541_s30 = int_to_ptr.hbm [resolvable:$true] %s540_s30 }
  0x37   : > { %351 = vmatpush.msra.mxu1 %v320_v9  ;;  %v318_v13 = vld [vmem:[#allocation5 + $0x1d0] sm:$0xff]  ;;  %378 = vmatpush.msra.mxu2 %v287_v6  ;;  %v316_v15 = vld [vmem:[#allocation5 + $0x1c0] sm:$0xff]  ;;  %v283_v16 = vld [vmem:[#allocation5 + $0xb8] sm:$0xff]  ;;  %s863_s24 = sshra.s32 %s541_s30, 4  ;;  %s864_s24 = int_to_ptr.hbm [resolvable:$true] %s863_s24 }
  0x38   : > { %404 = vmatpush.msra.mxu3 %v319_v7  ;;  %326 = vmatpush.msra.mxu0 %v286_v12  ;;  %v315_v17 = vld [vmem:[#allocation5 + $0x1b8] sm:$0xff]  ;;  %v282_v18 = vld [vmem:[#allocation5 + $0xb0] sm:$0xff]  ;;  %v281_v20 = vld [vmem:[#allocation5 + $0xa8] sm:$0xff]  ;;  %s865_s19 = scalar_lea.hbm %s864_s24, 24  ;;  %p870_p11 = scmp.lt.s32.totalorder %s864_s24, %s1117_s4 }
  0x39   : > { %352 = vmatpush.msra.mxu1 %v318_v13  ;;  %379 = vmatpush.msra.mxu2 %v285_v10  ;;  %v314_v19 = vld [vmem:[#allocation5 + $0x1b0] sm:$0xff]  ;;  %v313_v21 = vld [vmem:[#allocation5 + $0x1a8] sm:$0xff]  ;;  %v280_v22 = vld [vmem:[#allocation5 + $0xa0] sm:$0xff]  ;;  %p866_p1 = scmp.ne.s32.totalorder %s864_s24, %s865_s19  ;;  %p871_p9 = scmp.lt.s32.totalorder %s869_s5, %s865_s19 }
  0x3a   : > { %405 = vmatpush.msra.mxu3 %v317_v11  ;;  %327 = vmatpush.msra.mxu0 %v284_v14  ;;  %v312_v23 = vld [vmem:[#allocation5 + $0x1a0] sm:$0xff]  ;;  %v279_v24 = vld [vmem:[#allocation5 + $0x98] sm:$0xff]  ;;  %v278_v26 = vld [vmem:[#allocation5 + $0x90] sm:$0xff] }
  0x3b   : > { %353 = vmatpush.msra.mxu1 %v316_v15  ;;  %380 = vmatpush.msra.mxu2 %v283_v16  ;;  %v311_v25 = vld [vmem:[#allocation5 + $0x198] sm:$0xff]  ;;  %v310_v27 = vld [vmem:[#allocation5 + $0x190] sm:$0xff]  ;;  %v277_v28 = vld [vmem:[#allocation5 + $0x88] sm:$0xff]  ;;  %p867_p4 = pnand %p866_p1, %p1026_p5  ;;  %p872_p2 = por %p871_p9, %p870_p11 }
  0x3c   : > { %406 = vmatpush.msra.mxu3 %v315_v17  ;;  %328 = vmatpush.msra.mxu0 %v282_v18  ;;  %v309_v29 = vld [vmem:[#allocation5 + $0x188] sm:$0xff]  ;;  %v276_v30 = vld [vmem:[#allocation5 + $0x80] sm:$0xff]  ;;  %v275_v32 = vld [vmem:[#allocation5 + $0x78] sm:$0xff] }
  0x3d   : > { %354 = vmatpush.msra.mxu1 %v314_v19  ;;  %381 = vmatpush.msra.mxu2 %v281_v20  ;;  %v308_v31 = vld [vmem:[#allocation5 + $0x180] sm:$0xff]  ;;  %v307_v33 = vld [vmem:[#allocation5 + $0x178] sm:$0xff]  ;;  %v274_v34 = vld [vmem:[#allocation5 + $0x70] sm:$0xff]  ;;  %p868_p8 = pneg %p867_p4 }
  0x3e   : > { %407 = vmatpush.msra.mxu3 %v313_v21  ;;  %329 = vmatpush.msra.mxu0 %v280_v22  ;;  %v306_v35 = vld [vmem:[#allocation5 + $0x170] sm:$0xff]  ;;  %v273_v36 = vld [vmem:[#allocation5 + $0x68] sm:$0xff]  ;;  %v272_v38 = vld [vmem:[#allocation5 + $0x60] sm:$0xff] }
  0x3f   : > { %355 = vmatpush.msra.mxu1 %v312_v23  ;;  %382 = vmatpush.msra.mxu2 %v279_v24  ;;  %v305_v37 = vld [vmem:[#allocation5 + $0x168] sm:$0xff]  ;;  %v304_v39 = vld [vmem:[#allocation5 + $0x160] sm:$0xff]  ;;  %v271_v40 = vld [vmem:[#allocation5 + $0x58] sm:$0xff]  ;;  %p873_p10 = pnand %p872_p2, %p868_p8 }
  0x40   : > { %408 = vmatpush.msra.mxu3 %v311_v25  ;;  %330 = vmatpush.msra.mxu0 %v278_v26  ;;  %v303_v41 = vld [vmem:[#allocation5 + $0x158] sm:$0xff]  ;;  %v270_v42 = vld [vmem:[#allocation5 + $0x50] sm:$0xff]  ;;  %v269_v44 = vld [vmem:[#allocation5 + $0x48] sm:$0xff] }
  0x41   : > { %356 = vmatpush.msra.mxu1 %v310_v27  ;;  %383 = vmatpush.msra.mxu2 %v277_v28  ;;  %v302_v43 = vld [vmem:[#allocation5 + $0x150] sm:$0xff]  ;;  %v301_v45 = vld [vmem:[#allocation5 + $0x148] sm:$0xff]  ;;  %v268_v46 = vld [vmem:[#allocation5 + $0x40] sm:$0xff] }
  0x42   : > { %409 = vmatpush.msra.mxu3 %v309_v29  ;;  %331 = vmatpush.msra.mxu0 %v276_v30  ;;  %v300_v47 = vld [vmem:[#allocation5 + $0x140] sm:$0xff]  ;;  %v267_v48 = vld [vmem:[#allocation5 + $0x38] sm:$0xff]  ;;  %v266_v50 = vld [vmem:[#allocation5 + $0x30] sm:$0xff] }
  0x43   : > { %357 = vmatpush.msra.mxu1 %v308_v31  ;;  %384 = vmatpush.msra.mxu2 %v275_v32  ;;  %v299_v49 = vld [vmem:[#allocation5 + $0x138] sm:$0xff]  ;;  %v298_v51 = vld [vmem:[#allocation5 + $0x130] sm:$0xff]  ;;  %v265_v52 = vld [vmem:[#allocation5 + $0x28] sm:$0xff] }
  0x44   : > { %410 = vmatpush.msra.mxu3 %v307_v33  ;;  %332 = vmatpush.msra.mxu0 %v274_v34  ;;  %v297_v53 = vld [vmem:[#allocation5 + $0x128] sm:$0xff]  ;;  %v264_v54 = vld [vmem:[#allocation5 + $0x20] sm:$0xff]  ;;  %v263_v56 = vld [vmem:[#allocation5 + $0x18] sm:$0xff] }
  0x45   : > { %358 = vmatpush.msra.mxu1 %v306_v35  ;;  %385 = vmatpush.msra.mxu2 %v273_v36  ;;  %v296_v55 = vld [vmem:[#allocation5 + $0x120] sm:$0xff]  ;;  %v295_v57 = vld [vmem:[#allocation5 + $0x118] sm:$0xff]  ;;  %v262_v58 = vld [vmem:[#allocation5 + $0x10] sm:$0xff] }
  0x46   : > { %411 = vmatpush.msra.mxu3 %v305_v37  ;;  %333 = vmatpush.msra.mxu0 %v272_v38  ;;  %v294_v59 = vld [vmem:[#allocation5 + $0x110] sm:$0xff]  ;;  %v261_v60 = vld [vmem:[#allocation5 + $0x8] sm:$0xff]  ;;  %v260_v0 = vld [vmem:[#allocation5] sm:$0xff] }
  0x47   : > { %359 = vmatpush.msra.mxu1 %v304_v39  ;;  %386 = vmatpush.msra.mxu2 %v271_v40  ;;  %v293_v61 = vld [vmem:[#allocation5 + $0x108] sm:$0xff]  ;;  %v254_v62 = vld [vmem:[%s1060_s8] sm:$0xff]  ;;  %v449_v2 = vld [vmem:[#allocation7 + $0x78] sm:$0xff] }
  0x48   : > { %412 = vmatpush.msra.mxu3 %v303_v41  ;;  %334 = vmatpush.msra.mxu0 %v270_v42  ;;  %v255_v63 = vld [vmem:[%s1060_s8 + $0x8] sm:$0xff]  ;;  %v292_v1 = vld [vmem:[#allocation5 + $0x100] sm:$0xff]  ;;  %v448_v4 = vld [vmem:[#allocation7 + $0x70] sm:$0xff] }
  0x49   : > { %360 = vmatpush.msra.mxu1 %v302_v43  ;;  %387 = vmatpush.msra.mxu2 %v269_v44  ;;  %v465_v3 = vld [vmem:[#allocation7 + $0xf8] sm:$0xff]  ;;  %v464_v5 = vld [vmem:[#allocation7 + $0xf0] sm:$0xff]  ;;  %v447_v6 = vld [vmem:[#allocation7 + $0x68] sm:$0xff] }
  0x4a   : > { %413 = vmatpush.msra.mxu3 %v301_v45  ;;  %335 = vmatpush.msra.mxu0 %v268_v46  ;;  %v463_v7 = vld [vmem:[#allocation7 + $0xe8] sm:$0xff]  ;;  %v256_v8 = vld [vmem:[%s1060_s8 + $0x10] sm:$0xff]  ;;  %v445_v12 = vld [vmem:[#allocation7 + $0x58] sm:$0xff] }
  0x4b   : > { %361 = vmatpush.msra.mxu1 %v300_v47  ;;  %388 = vmatpush.msra.mxu2 %v267_v48  ;;  %v257_v9 = vld [vmem:[%s1060_s8 + $0x18] sm:$0xff]  ;;  %v446_v10 = vld [vmem:[#allocation7 + $0x60] sm:$0xff]  ;;  %v444_v14 = vld [vmem:[#allocation7 + $0x50] sm:$0xff] }
  0x4c   : > { %414 = vmatpush.msra.mxu3 %v299_v49  ;;  %336 = vmatpush.msra.mxu0 %v266_v50  ;;  %v462_v11 = vld [vmem:[#allocation7 + $0xe0] sm:$0xff]  ;;  %v461_v13 = vld [vmem:[#allocation7 + $0xd8] sm:$0xff]  ;;  %v460_v15 = vld [vmem:[#allocation7 + $0xd0] sm:$0xff] }
  0x4d   : > { %362 = vmatpush.msra.mxu1 %v298_v51  ;;  %389 = vmatpush.msra.mxu2 %v265_v52  ;;  %v443_v16 = vld [vmem:[#allocation7 + $0x48] sm:$0xff]  ;;  %v258_v18 = vld [vmem:[%s1060_s8 + $0x20] sm:$0xff]  ;;  %v441_v21 = vld [vmem:[#allocation7 + $0x38] sm:$0xff] }
  0x4e   : > { %415 = vmatpush.msra.mxu3 %v297_v53  ;;  %337 = vmatpush.msra.mxu0 %v264_v54  ;;  %v459_v17 = vld [vmem:[#allocation7 + $0xc8] sm:$0xff]  ;;  %v442_v20 = vld [vmem:[#allocation7 + $0x40] sm:$0xff]  ;;  %v440_v23 = vld [vmem:[#allocation7 + $0x30] sm:$0xff] }
  0x4f   : > { %363 = vmatpush.msra.mxu1 %v296_v55  ;;  %390 = vmatpush.msra.mxu2 %v263_v56  ;;  %v259_v19 = vld [vmem:[%s1060_s8 + $0x28] sm:$0xff]  ;;  %v458_v22 = vld [vmem:[#allocation7 + $0xc0] sm:$0xff]  ;;  %v456_v26 = vld [vmem:[#allocation7 + $0xb0] sm:$0xff] }
  0x50   : > { %416 = vmatpush.msra.mxu3 %v295_v57  ;;  %338 = vmatpush.msra.mxu0 %v262_v58  ;;  %v457_v24 = vld [vmem:[#allocation7 + $0xb8] sm:$0xff]  ;;  %v439_v25 = vld [vmem:[#allocation7 + $0x28] sm:$0xff]  ;;  %v438_v27 = vld [vmem:[#allocation7 + $0x20] sm:$0xff] }
  0x51   : > { %364 = vmatpush.msra.mxu1 %v294_v59  ;;  %391 = vmatpush.msra.mxu2 %v261_v60  ;;  %v455_v28 = vld [vmem:[#allocation7 + $0xa8] sm:$0xff]  ;;  %v437_v29 = vld [vmem:[#allocation7 + $0x18] sm:$0xff]  ;;  %v454_v30 = vld [vmem:[#allocation7 + $0xa0] sm:$0xff] }
  0x52   : > { %417 = vmatpush.msra.mxu3 %v293_v61  ;;  %392 = vmatmul.f32.vlgmr.msra.gmra.mxu2 %v254_v62  ;;  %v436_v31 = vld [vmem:[#allocation7 + $0x10] sm:$0xff]  ;;  %v453_v32 = vld [vmem:[#allocation7 + $0x98] sm:$0xff]  ;;  %v435_v33 = vld [vmem:[#allocation7 + $0x8] sm:$0xff] }
  0x53   : > { %418 = vmatmul.f32.vlgmr.msra.gmra.mxu3 %v255_v63  ;;  %339 = vmatpush.msra.mxu0 %v260_v0  ;;  %v452_v34 = vld [vmem:[#allocation7 + $0x90] sm:$0xff]  ;;  %v434_v35 = vld [vmem:[#allocation7] sm:$0xff]  ;;  %v451_v36 = vld [vmem:[#allocation7 + $0x88] sm:$0xff] }
  0x54   : > { %365 = vmatpush.msra.mxu1 %v292_v1  ;;  %340 = vmatmul.f32.vlgmr.msra.gmra.mxu0 %v254_v62  ;;  %v450_v37 = vld [vmem:[#allocation7 + $0x80] sm:$0xff] }
  0x55   : > { %366 = vmatmul.f32.vlgmr.msra.gmra.mxu1 %v255_v63  ;;  %470 = vmatpush.msrb.mxu0 %v449_v2  ;;  %v758_v62 = vld [vmem:[%s1116_s3] ss:$0 sm:$0xff] }
  0x56   : > { %496 = vmatpush.msrb.mxu1 %v465_v3  ;;  %650 = vmatpush.msrb.mxu2 %v449_v2 }
  0x57   : > { %666 = vmatpush.msrb.mxu3 %v465_v3  ;;  %471 = vmatpush.msrb.mxu0 %v448_v4 }
  0x58   : > { %497 = vmatpush.msrb.mxu1 %v464_v5  ;;  %651 = vmatpush.msrb.mxu2 %v448_v4 }
  0x59   : > { %667 = vmatpush.msrb.mxu3 %v464_v5  ;;  %472 = vmatpush.msrb.mxu0 %v447_v6 }
  0x5a   : > { %498 = vmatpush.msrb.mxu1 %v463_v7  ;;  %395 = vmatmul.f32.gmra.mxu2 %v256_v8 }
  0x5b   : > { %421 = vmatmul.f32.gmra.mxu3 %v257_v9  ;;  %473 = vmatpush.msrb.mxu0 %v446_v10 }
  0x5c   : > { %499 = vmatpush.msrb.mxu1 %v462_v11  ;;  %343 = vmatmul.f32.gmra.mxu0 %v256_v8 }
  0x5d   : > { %369 = vmatmul.f32.gmra.mxu1 %v257_v9  ;;  %474 = vmatpush.msrb.mxu0 %v445_v12 }
  0x5e   : > { %500 = vmatpush.msrb.mxu1 %v461_v13  ;;  %652 = vmatpush.msrb.mxu2 %v447_v6 }
  0x5f   : > { %668 = vmatpush.msrb.mxu3 %v463_v7  ;;  %475 = vmatpush.msrb.mxu0 %v444_v14 }
  0x60   : > { %501 = vmatpush.msrb.mxu1 %v460_v15  ;;  %653 = vmatpush.msrb.mxu2 %v446_v10 }
  0x61   : > { %669 = vmatpush.msrb.mxu3 %v462_v11  ;;  %476 = vmatpush.msrb.mxu0 %v443_v16 }
  0x62   : > { %502 = vmatpush.msrb.mxu1 %v459_v17  ;;  %398 = vmatmul.f32.gmra.mxu2 %v258_v18 }
  0x63   : > { %424 = vmatmul.f32.gmra.mxu3 %v259_v19  ;;  %477 = vmatpush.msrb.mxu0 %v442_v20 }
  0x64   : > { %654 = vmatpush.msrb.mxu2 %v445_v12  ;;  %346 = vmatmul.f32.gmra.mxu0 %v258_v18 }
  0x65   : > { %372 = vmatmul.f32.gmra.mxu1 %v259_v19  ;;  %478 = vmatpush.msrb.mxu0 %v441_v21 }
  0x66   : > { %503 = vmatpush.msrb.mxu1 %v458_v22  ;;  %655 = vmatpush.msrb.mxu2 %v444_v14 }
  0x67   : > { %670 = vmatpush.msrb.mxu3 %v461_v13  ;;  %479 = vmatpush.msrb.mxu0 %v440_v23 }
  0x68   : > { %504 = vmatpush.msrb.mxu1 %v457_v24  ;;  %656 = vmatpush.msrb.mxu2 %v443_v16 }
  0x69   : > { %671 = vmatpush.msrb.mxu3 %v460_v15  ;;  %480 = vmatpush.msrb.mxu0 %v439_v25 }
  0x6a   : > { %505 = vmatpush.msrb.mxu1 %v456_v26  ;;  %657 = vmatpush.msrb.mxu2 %v442_v20 }
  0x6b   : > { %672 = vmatpush.msrb.mxu3 %v459_v17  ;;  %481 = vmatpush.msrb.mxu0 %v438_v27 }
  0x6c   : > { %506 = vmatpush.msrb.mxu1 %v455_v28  ;;  %658 = vmatpush.msrb.mxu2 %v441_v21 }
  0x6d   : > { %673 = vmatpush.msrb.mxu3 %v458_v22  ;;  %482 = vmatpush.msrb.mxu0 %v437_v29 }
  0x6e   : > { %507 = vmatpush.msrb.mxu1 %v454_v30  ;;  %659 = vmatpush.msrb.mxu2 %v440_v23 }
  0x6f   : > { %674 = vmatpush.msrb.mxu3 %v457_v24  ;;  %483 = vmatpush.msrb.mxu0 %v436_v31 }
  0x70   : > { %660 = vmatpush.msrb.mxu2 %v439_v25  ;;  %508 = vmatpush.msrb.mxu1 %v453_v32 }
  0x71   : > { %675 = vmatpush.msrb.mxu3 %v456_v26  ;;  %484 = vmatpush.msrb.mxu0 %v435_v33 }
  0x72   : > { %661 = vmatpush.msrb.mxu2 %v438_v27  ;;  %509 = vmatpush.msrb.mxu1 %v452_v34 }
  0x73   : > { %676 = vmatpush.msrb.mxu3 %v455_v28  ;;  %485 = vmatpush.msrb.mxu0 %v434_v35 }
  0x74   : > { %662 = vmatpush.msrb.mxu2 %v437_v29  ;;  %510 = vmatpush.msrb.mxu1 %v451_v36 }
  0x75   : > { %677 = vmatpush.msrb.mxu3 %v454_v30 }
  0x76   : > { %663 = vmatpush.msrb.mxu2 %v436_v31  ;;  %511 = vmatpush.msrb.mxu1 %v450_v37 }
  0x77   : > { %678 = vmatpush.msrb.mxu3 %v453_v32 }
  0x78   : > { %664 = vmatpush.msrb.mxu2 %v435_v33 }
  0x79   : > { %679 = vmatpush.msrb.mxu3 %v452_v34 }
  0x7a   : > { %665 = vmatpush.msrb.mxu2 %v434_v35 }
  0x7b   : > { %680 = vmatpush.msrb.mxu3 %v451_v36 }
  0x7d   : > { %681 = vmatpush.msrb.mxu3 %v450_v37 }
  0xd1   : > { %v341_v38 = vpop.f32.mrf.mxu0 }
  0xd2   : > { %v367_v39 = vpop.f32.mrf.mxu1 }
  0xd3   : > { %v368_v40 = vadd.f32 %v367_v39, %v341_v38 }
  0xd5   : > { %v428_v41 = vmul.f32 %v368_v40, %v368_v40  ;;  %v393_v42 = vpop.f32.mrf.mxu2 }
  0xd6   : > { %v419_v43 = vpop.f32.mrf.mxu3 }
  0xd7   : > { %v420_v44 = vadd.f32 %v419_v43, %v393_v42  ;;  %486 = vmatmul.f32.vlgmr.msrb.gmra.mxu0 %v428_v41 }
  0xd9   : > { %v429_v45 = vmul.f32 %v420_v44, %v420_v44  ;;  %v344_v46 = vpop.f32.mrf.mxu0 }
  0xda   : > { %v370_v47 = vpop.f32.mrf.mxu1 }
  0xdb   : > { %512 = vmatmul.f32.vlgmr.msrb.gmra.mxu1 %v429_v45  ;;  %v371_v48 = vadd.f32 %v370_v47, %v344_v46 }
  0xdd   : > { %v430_v49 = vmul.f32 %v371_v48, %v371_v48  ;;  %v396_v50 = vpop.f32.mrf.mxu2 }
  0xde   : > { %v422_v51 = vpop.f32.mrf.mxu3 }
  0xdf   : > { %v423_v52 = vadd.f32 %v422_v51, %v396_v50  ;;  %489 = vmatmul.f32.vlgmr.msrb.gmra.mxu2 %v430_v49 }
  0xe1   : > { %v431_v53 = vmul.f32 %v423_v52, %v423_v52  ;;  %v347_v54 = vpop.f32.mrf.mxu0 }
  0xe2   : > { %v373_v55 = vpop.f32.mrf.mxu1 }
  0xe3   : > { %515 = vmatmul.f32.vlgmr.msrb.gmra.mxu3 %v431_v53  ;;  %v374_v56 = vadd.f32 %v373_v55, %v347_v54 }
  0xe5   : > { %v432_v57 = vmul.f32 %v374_v56, %v374_v56  ;;  %v399_v58 = vpop.f32.mrf.mxu2 }
  0xe6   : > { %v425_v59 = vpop.f32.mrf.mxu3 }
  0xe7   : > { %v426_v60 = vadd.f32 %v425_v59, %v399_v58  ;;  %492 = vmatmul.f32.gmra.mxu2 %v432_v57 }
  0xe9   : > { %v433_v61 = vmul.f32 %v426_v60, %v426_v60 }
  0xeb   : > { %518 = vmatmul.f32.gmra.mxu3 %v433_v61 }
 0x154   : > { %v487_v63 = vpop.f32.mrf.mxu0 }
 0x155   : > { %v488_v0 = vadd.f32 %v758_v62, %v487_v63 }
 0x158   : > { %v513_v1 = vpop.f32.mrf.mxu1 }
 0x159   : > { %v514_v2 = vadd.f32 %v513_v1, %v488_v0 }
 0x15b   : > { %522 = vst [vmem:[%s251_s9] sm:$0xff] %v514_v2 }
 0x162   : > { %v490_v3 = vpop.f32.mrf.mxu2 }
 0x163   : > { %v491_v4 = vadd.f32 %v758_v62, %v490_v3 }
 0x166   : > { %v516_v5 = vpop.f32.mrf.mxu3 }
 0x167   : > { %v517_v6 = vadd.f32 %v516_v5, %v491_v4 }
 0x169   : > { %523 = vst [vmem:[%s251_s9 + $0x8] sm:$0xff] %v517_v6 }
 0x16a   : > { %v493_v7 = vpop.f32.mrf.mxu2 }
 0x16b   : > { %v494_v8 = vadd.f32 %v758_v62, %v493_v7 }
 0x16e   : > { %v519_v9 = vpop.f32.mrf.mxu3 }
 0x16f   : > { %v520_v10 = vadd.f32 %v519_v9, %v494_v8 }
 0x171   : > { %524 = vst [vmem:[%s251_s9 + $0x10] sm:$0xff] %v520_v10 }
 0x172   : > { %876 = shalt.err (!%p873_p10)
}
 0x173   : > { %s927_s6 = smov 128   ;;  %s928_s26 = smov 8  }
 0x174   : > { %695 = dma.vmem_to_hbm [thread:$0]  (%p1026_p5), %s539_s29, 384, %s541_s30, %s526_s27, %s927_s6, %s927_s6, %s928_s26  }
 0x175 PF: > { %s555_s28 = sand.u32 1, %s907_s15   ;;  %p1127_p12 = scmp.ge.s32.totalorder %s919_s18, 2 }
 0x176   : > { %s556_s9 = scalar_lea.sflag [#allocation4], %s555_s28 }
 0x177   : > { %p709_p13 = pnand %p1127_p12, %p989_p6 }
 0x179   : > { %p710_p0 = pneg %p709_p13 }
 0x17b   : > { %902 = dma.done.wait (%p710_p0), %s556_s9, 384  }
 0x17c   : > { %904 = vsyncadd (%p710_p0), %s556_s9, 4294966912  ;;  %p18_p3 = scmp.ge.s32.totalorder %s1013_s12, 4   ;;  %s1128_s15 = smov %s911_s16 }
 0x17d   : > { %s1129_s16 = smov %s915_s17  ;;  %s1130_s17 = smov %s1022_s20 }
 0x17e   : > { %s1131_s18 = smov %s1013_s12  ;;  %20 = sbr.rel (!%p18_p3) target bundleno = 6 (0x6), region = 89 }
 0x183   :  { %562 = vsyncpa [#allocation3], 1 }
 0x184   :  { %564 = vsyncpa [#allocation3 + $0x1], 1 }
 0x185   :  { %565 = vsyncpa [#allocation6], 1 }
 0x186   :  { %566 = vsyncpa [#allocation4], 1 }
 0x187   :  { %568 = vsyncpa [#allocation4 + $0x1], 1 }

</bundles_post_ra>
